<compile_context>
chip_gen: v6e
topology: v6e:2x2x1
jax: 0.10.0
libtpu: 0.0.40
codegen_flags: <defaults>
</compile_context>

<pallas_src>
import functools

import jax
import jax.numpy as jnp
from jax.experimental import pallas as pl
from jax.experimental.pallas import tpu as pltpu


def _round_up(x, m):
    return ((x + m - 1) // m) * m


def _triplet_loss_kernel(anc_ref, pos_ref, neg_ref, out_ref, row_acc_ref, *,
                         margin, batch, tile_b):
    # Grid positions hoisted out of pl.when bodies (see header comment).
    i = pl.program_id(0)
    j = pl.program_id(1)
    last_j = pl.num_programs(1) - 1

    # Reset the per-row accumulator at the start of each batch tile's
    # feature-axis sweep.
    @pl.when(j == 0)
    def _():
        row_acc_ref[...] = jnp.zeros_like(row_acc_ref)

    a = anc_ref[...].astype(jnp.float32)
    p = pos_ref[...].astype(jnp.float32)
    n = neg_ref[...].astype(jnp.float32)

    # Fused difference of squared distances:
    #   (a-p)^2 - (a-n)^2 == (n-p) * (2a - p - n)
    t = (n - p) * (2.0 * a - p - n)
    row_acc_ref[...] += jnp.sum(t, axis=-1, keepdims=True)  # (TILE_B, 1)

    # Finalize on the last feature step only: margin, clamp, mask padded rows,
    # reduce this batch tile to a single partial sum.
    @pl.when(j == last_j)
    def _():
        loss_rows = jnp.maximum(row_acc_ref[...] + margin, 0.0)        # (TILE_B, 1)
        row_ids = i * tile_b + jax.lax.broadcasted_iota(jnp.int32, (tile_b, 1), 0)
        loss_rows = jnp.where(row_ids < batch, loss_rows, 0.0)
        partial = jnp.sum(loss_rows)
        out_ref[...] = jnp.broadcast_to(partial, (1, 8, 128)).astype(jnp.float32)


def semi_hard_triplet_loss(anc, pos, neg, margin, *, tile_b=512, tile_d=1024):
    """Pallas equivalent of SemiHardTripletLoss.forward. Returns a scalar."""
    assert anc.shape == pos.shape == neg.shape and anc.ndim == 2
    b, d = anc.shape

    # Tile sizes: multiples of (8, 128), capped at the (padded) array extents.
    tb = min(_round_up(tile_b, 8), _round_up(b, 8))
    td = min(_round_up(tile_d, 128), _round_up(d, 128))

    bp = _round_up(b, tb)
    dp = _round_up(d, td)

    def pad(x):
        if (bp, dp) != (b, d):
            x = jnp.pad(x, ((0, bp - b), (0, dp - d)))
        return x

    anc_p, pos_p, neg_p = pad(anc), pad(pos), pad(neg)

    n_b = bp // tb
    n_d = dp // td

    kernel = functools.partial(
        _triplet_loss_kernel, margin=float(margin), batch=b, tile_b=tb)

    in_spec = pl.BlockSpec((tb, td), lambda i, j: (i, j))

    partials = pl.pallas_call(
        kernel,
        out_shape=jax.ShapeDtypeStruct((n_b, 8, 128), jnp.float32),
        grid=(n_b, n_d),
        in_specs=[in_spec, in_spec, in_spec],
        out_specs=pl.BlockSpec((1, 8, 128), lambda i, j: (i, 0, 0)),
        scratch_shapes=[pltpu.VMEM((tb, 1), jnp.float32)],
        compiler_params=pltpu.CompilerParams(
            dimension_semantics=("parallel", "arbitrary"),
            vmem_limit_bytes=32 * 1024 * 1024,
        ),
    )(anc_p, pos_p, neg_p)

    return jnp.sum(partials[:, 0, 0]) / b


def _reference(anc, pos, neg, margin):
    a = anc.astype(jnp.float32)
    p = pos.astype(jnp.float32)
    n = neg.astype(jnp.float32)
    diff_pos = jnp.sum((a - p) ** 2, axis=-1)
    diff_neg = jnp.sum((a - n) ** 2, axis=-1)
    return jnp.mean(jnp.maximum(diff_pos - diff_neg + margin, 0.0))


if __name__ == "__main__":
    key = jax.random.PRNGKey(0)
    margin = 0.5

    # --- Small shape consistent with the module: (batch, num_features) ------
    batch, num_features = 8, 128
    k1, k2, k3, k4, k5, k6 = jax.random.split(key, 6)
    anc = jax.random.normal(k1, (batch, num_features), dtype=jnp.float32)
    pos = jax.random.normal(k2, (batch, num_features), dtype=jnp.float32)
    neg = jax.random.normal(k3, (batch, num_features), dtype=jnp.float32)

    loss = semi_hard_triplet_loss(anc, pos, neg, margin)
    jax.block_until_ready(loss)
    ref = _reference(anc, pos, neg, margin)
    assert jnp.allclose(loss, ref, rtol=1e-5, atol=1e-5), (loss, ref)

    # --- Exercise the tiled / padded / masked path (bf16 inputs) ------------
    b2, d2 = 20, 384
    anc2 = jax.random.normal(k4, (b2, d2), dtype=jnp.bfloat16)
    pos2 = jax.random.normal(k5, (b2, d2), dtype=jnp.bfloat16)
    neg2 = jax.random.normal(k6, (b2, d2), dtype=jnp.bfloat16)

    loss2 = semi_hard_triplet_loss(anc2, pos2, neg2, margin, tile_b=8, tile_d=128)
    jax.block_until_ready(loss2)
    ref2 = _reference(anc2, pos2, neg2, margin)
    assert jnp.allclose(loss2, ref2, rtol=1e-4, atol=1e-4), (loss2, ref2)

    print("KERNEL_OK")
</pallas_src>

<mosaic_0001>
module attributes {stable_mosaic.version = 11 : i64} {
  func.func @_triplet_loss_kernel(%arg0: i32, %arg1: i32, %arg2: memref<8x128xf32, #tpu.memory_space<vmem>>, %arg3: memref<8x128xf32, #tpu.memory_space<vmem>>, %arg4: memref<8x128xf32, #tpu.memory_space<vmem>>, %arg5: memref<1x8x128xf32, #tpu.memory_space<vmem>>, %arg6: memref<8x1xf32, #tpu.memory_space<vmem>>) attributes {dimension_semantics = [#tpu.dimension_semantics<parallel>, #tpu.dimension_semantics<arbitrary>], iteration_bounds = array<i64: 1, 1>, scalar_prefetch = 0 : i64, scratch_operands = 1 : i64, tpu.core_type = #tpu.core_type<tc>, window_params = [{transform_indices = @transform_0, window_bounds = array<i64: 8, 128>}, {transform_indices = @transform_1, window_bounds = array<i64: 8, 128>}, {transform_indices = @transform_2, window_bounds = array<i64: 8, 128>}, {transform_indices = @transform_3, window_bounds = array<i64: 1, 8, 128>}]} {
    %c0_i32 = arith.constant 0 : i32
    %0 = arith.cmpi eq, %arg1, %c0_i32 : i32
    %1 = arith.extui %0 : i1 to i32
    %c0_i32_0 = arith.constant 0 : i32
    %2 = arith.cmpi ne, %1, %c0_i32_0 : i32
    scf.if %2 {
      %cst_13 = arith.constant 0.000000e+00 : f32
      %20 = vector.broadcast %cst_13 : f32 to vector<8x1xf32>
      %c0_14 = arith.constant 0 : index
      %c0_15 = arith.constant 0 : index
      %21 = vector.load %arg6[%c0_14, %c0_15] : memref<8x1xf32, #tpu.memory_space<vmem>>, vector<8x1xf32>
      tpu.vector_store %arg6[%c0_14, %c0_15], %20 {strides = array<i32>} : memref<8x1xf32, #tpu.memory_space<vmem>>, vector<8x1xf32>,
    } else {
    }
    %c0 = arith.constant 0 : index
    %c0_1 = arith.constant 0 : index
    %3 = vector.load %arg2[%c0, %c0_1] : memref<8x128xf32, #tpu.memory_space<vmem>>, vector<8x128xf32>
    %c0_2 = arith.constant 0 : index
    %c0_3 = arith.constant 0 : index
    %4 = vector.load %arg3[%c0_2, %c0_3] : memref<8x128xf32, #tpu.memory_space<vmem>>, vector<8x128xf32>
    %c0_4 = arith.constant 0 : index
    %c0_5 = arith.constant 0 : index
    %5 = vector.load %arg4[%c0_4, %c0_5] : memref<8x128xf32, #tpu.memory_space<vmem>>, vector<8x128xf32>
    %6 = arith.subf %5, %4 : vector<8x128xf32>
    %cst = arith.constant 2.000000e+00 : f32
    %7 = vector.broadcast %cst : f32 to vector<8x128xf32>
    %8 = arith.mulf %7, %3 : vector<8x128xf32>
    %9 = arith.subf %8, %4 : vector<8x128xf32>
    %10 = arith.subf %9, %5 : vector<8x128xf32>
    %11 = arith.mulf %6, %10 : vector<8x128xf32>
    %c0_6 = arith.constant 0 : index
    %c0_7 = arith.constant 0 : index
    %12 = vector.load %arg6[%c0_6, %c0_7] : memref<8x1xf32, #tpu.memory_space<vmem>>, vector<8x1xf32>
    %cst_8 = arith.constant dense<0.000000e+00> : vector<8xf32>
    %13 = vector.multi_reduction <add>, %11, %cst_8 [1] : vector<8x128xf32> to vector<8xf32>
    %14 = vector.shape_cast %13 : vector<8xf32> to vector<8x1xf32>
    %15 = arith.addf %12, %14 : vector<8x1xf32>
    %c0_9 = arith.constant 0 : index
    %c0_10 = arith.constant 0 : index
    %16 = vector.load %arg6[%c0_9, %c0_10] : memref<8x1xf32, #tpu.memory_space<vmem>>, vector<8x1xf32>
    tpu.vector_store %arg6[%c0_9, %c0_10], %15 {strides = array<i32>} : memref<8x1xf32, #tpu.memory_space<vmem>>, vector<8x1xf32>,
    %c0_i32_11 = arith.constant 0 : i32
    %17 = arith.cmpi eq, %arg1, %c0_i32_11 : i32
    %18 = arith.extui %17 : i1 to i32
    %c0_i32_12 = arith.constant 0 : i32
    %19 = arith.cmpi ne, %18, %c0_i32_12 : i32
    scf.if %19 {
      %c0_13 = arith.constant 0 : index
      %c0_14 = arith.constant 0 : index
      %20 = vector.load %arg6[%c0_13, %c0_14] : memref<8x1xf32, #tpu.memory_space<vmem>>, vector<8x1xf32>
      %cst_15 = arith.constant 5.000000e-01 : f32
      %21 = vector.broadcast %cst_15 : f32 to vector<8x1xf32>
      %22 = arith.addf %20, %21 : vector<8x1xf32>
      %cst_16 = arith.constant 0.000000e+00 : f32
      %23 = vector.broadcast %cst_16 : f32 to vector<8x1xf32>
      %24 = arith.maximumf %22, %23 : vector<8x1xf32>
      %c8_i32 = arith.constant 8 : i32
      %25 = arith.muli %arg0, %c8_i32 : i32
      %26 = tpu.iota {dimensions = array<i32: 0>} : vector<8x1xi32>
      %27 = vector.broadcast %25 : i32 to vector<8x1xi32>
      %28 = arith.addi %27, %26 : vector<8x1xi32>
      %c8_i32_17 = arith.constant 8 : i32
      %29 = vector.broadcast %c8_i32_17 : i32 to vector<8x1xi32>
      %30 = arith.cmpi slt, %28, %29 : vector<8x1xi32>
      %cst_18 = arith.constant 0.000000e+00 : f32
      %31 = vector.broadcast %cst_18 : f32 to vector<8x1xf32>
      %32 = arith.select %30, %24, %31 : vector<8x1xi1>, vector<8x1xf32>
      %33 = vector.shape_cast %32 : vector<8x1xf32> to vector<1x8x1xf32>
      %cst_19 = arith.constant dense<0.000000e+00> : vector<1xf32>
      %34 = vector.multi_reduction <add>, %33, %cst_19 [1, 2] : vector<1x8x1xf32> to vector<1xf32>
      %35 = vector.shape_cast %34 : vector<1xf32> to vector<1x1x1xf32>
      %36 = vector.extract %35[0, 0, 0] : f32 from vector<1x1x1xf32>
      %37 = vector.broadcast %36 : f32 to vector<1x8x128xf32>
      %c0_20 = arith.constant 0 : index
      %c0_21 = arith.constant 0 : index
      %c0_22 = arith.constant 0 : index
      %38 = vector.load %arg5[%c0_20, %c0_21, %c0_22] : memref<1x8x128xf32, #tpu.memory_space<vmem>>, vector<1x8x128xf32>
      tpu.vector_store %arg5[%c0_20, %c0_21, %c0_22], %37 {strides = array<i32>} : memref<1x8x128xf32, #tpu.memory_space<vmem>>, vector<1x8x128xf32>,
    } else {
    }
    return
  }
  func.func @transform_0(%arg0: i32, %arg1: i32) -> (i32, i32) {
    %c0_i32 = arith.constant 0 : i32
    return %arg0, %arg1 : i32, i32
  }
  func.func @transform_1(%arg0: i32, %arg1: i32) -> (i32, i32) {
    %c0_i32 = arith.constant 0 : i32
    return %arg0, %arg1 : i32, i32
  }
  func.func @transform_2(%arg0: i32, %arg1: i32) -> (i32, i32) {
    %c0_i32 = arith.constant 0 : i32
    return %arg0, %arg1 : i32, i32
  }
  func.func @transform_3(%arg0: i32, %arg1: i32) -> (i32, i32, i32) {
    %c0_i32 = arith.constant 0 : i32
    %c0_i32_0 = arith.constant 0 : i32
    %c0_i32_1 = arith.constant 0 : i32
    return %arg0, %c0_i32, %c0_i32_0 : i32, i32, i32
  }
}

</mosaic_0001>

<bundles_post_ra>
// kernel: tpu_custom_call.1
= control target key start
LH: loop header
LB: loop body
LE: loop exit
PB: predicated region body
PF: predicated region fallthrough
CT: control target
= control target key end

     0   :  { %8 = vsyncpa [#allocation4], 0  ;;  %s244_s0 = inlined_call_operand.hbm [shape: f32[8,128], index: 0, kind: input, shape index: {}]   ;;  %s245_s1 = inlined_call_operand.hbm [shape: f32[8,128], index: 1, kind: input, shape index: {}]   ;;  %s246_s2 = inlined_call_operand.hbm [shape: f32[8,128], index: 2, kind: input, shape index: {}]   ;;  %s247_s3 = inlined_call_operand.hbm [shape: f32[1,8,128], index: 3, kind: output, shape index: {}]  }
   0x1   :  { %9 = vsyncpa [#allocation7], 0 }
   0x2   :  { %10 = vsyncpa [#allocation5], 0  ;;  %s204_s12 = smov [#allocation6]   ;;  %s205_s14 = smov [#allocation3]  }
   0x3   :  { %s27_s13 = sshll.u32 %s204_s12, 4  ;;  %s17_s15 = sshll.u32 %s205_s14, 4  ;;  %s28_s13 = int_to_ptr.vmem [resolvable:$true] %s27_s13  ;;  %s18_s15 = int_to_ptr.vmem [resolvable:$true] %s17_s15 }
   0x4   :  { %s126_s16 = scalar_lea.vmem %s28_s13, 128  ;;  %p131_p1 = scmp.lt.s32.totalorder %s28_s13, %s28_s13 }
   0x5   :  { %p127_p0 = scmp.ne.s32.totalorder %s28_s13, %s126_s16  ;;  %p132_p2 = scmp.lt.s32.totalorder %s126_s16, %s126_s16 }
   0x7   :  { %p133_p3 = por %p132_p2, %p131_p1 }
   0x9   :  { %p134_p4 = pnand %p133_p3, %p127_p0 }
   0xb   :  { %137 = shalt.err (!%p134_p4)
}
   0xc   :  { %30 = dma.hbm_to_vmem [thread:$0]  %s245_s1, 128, %s28_s13, [#allocation7]  }
   0xd   :  { %s146_s19 = scalar_lea.vmem %s18_s15, 128  ;;  %p151_p6 = scmp.lt.s32.totalorder %s18_s15, %s18_s15 }
   0xe   :  { %p147_p5 = scmp.ne.s32.totalorder %s18_s15, %s146_s19  ;;  %p152_p7 = scmp.lt.s32.totalorder %s146_s19, %s146_s19 }
  0x10   :  { %p153_p8 = por %p152_p7, %p151_p6 }
  0x12   :  { %p154_p9 = pnand %p153_p8, %p147_p5 }
  0x14   :  { %157 = shalt.err (!%p154_p9)
}
  0x15   :  { %20 = dma.hbm_to_vmem [thread:$0]  %s244_s0, 128, %s18_s15, [#allocation4]  }
  0x16   :  { %s206_s22 = smov [#allocation8]  }
  0x17   :  { %s37_s23 = sshll.u32 %s206_s22, 4  ;;  %s38_s23 = int_to_ptr.vmem [resolvable:$true] %s37_s23 }
  0x18   :  { %s166_s24 = scalar_lea.vmem %s38_s23, 128  ;;  %p171_p11 = scmp.lt.s32.totalorder %s38_s23, %s38_s23 }
  0x19   :  { %p167_p10 = scmp.ne.s32.totalorder %s38_s23, %s166_s24  ;;  %p172_p12 = scmp.lt.s32.totalorder %s166_s24, %s166_s24 }
  0x1b   :  { %p173_p13 = por %p172_p12, %p171_p11 }
  0x1d   :  { %p174_p0 = pnand %p173_p13, %p167_p10 }
  0x1f   :  { %177 = shalt.err (!%p174_p0)
}
  0x20   :  { %40 = dma.hbm_to_vmem [thread:$0]  %s246_s2, 128, %s38_s23, [#allocation7]  }
  0x21   :  { %198 = dma.done.wait [#allocation4], 128  }
  0x22   :  { %199 = vsyncadd [#allocation4], 4294967168 }
  0x23   :  { %200 = dma.done.wait [#allocation7], 256  }
  0x24   :  { %201 = vsyncadd [#allocation7], 4294967040  ;;  %vm54_vm0 = vcmask 7168   ;;  %v207_v0 = vmov 0.0   ;;  %v56_v1 = vld [vmem:[#allocation3] sm:$0xff]  ;;  %v57_v2 = vld [vmem:[#allocation6] sm:$0xff] }
  0x25   :  { %55 = vst.msk [vmem:[#allocation2] sm:$0xff] %vm54_vm0, %v207_v0  ;;  %v58_v3 = vld [vmem:[#allocation8] sm:$0xff]  ;;  %v60_v4 = vmul.f32 2.0, %v56_v1  ;;  %s208_s0 = smov [#allocation9]  }
  0x26   :  { %v59_v5 = vsub.f32 %v58_v3, %v57_v2  ;;  %s101_s2 = sshll.u32 %s208_s0, 4  ;;  %s102_s2 = int_to_ptr.vmem [resolvable:$true] %s101_s2 }
  0x27   :  { %v61_v6 = vsub.f32 %v60_v4, %v57_v2  ;;  %s178_s27 = scalar_lea.vmem %s102_s2, 128  ;;  %p183_p2 = scmp.lt.s32.totalorder %s102_s2, %s102_s2 }
  0x28   :  { %p179_p1 = scmp.ne.s32.totalorder %s102_s2, %s178_s27  ;;  %p184_p3 = scmp.lt.s32.totalorder %s178_s27, %s178_s27 }
  0x29   :  { %v62_v7 = vsub.f32 %v61_v6, %v58_v3 }
  0x2a   :  { %p185_p4 = por %p184_p3, %p183_p2 }
  0x2b   :  { %v63_v8 = vmul.f32 %v62_v7, %v59_v5 }
  0x2c   :  { %v64_v9 = vld [vmem:[#allocation2] sm:$0xff]  ;;  %p186_p5 = pnand %p185_p4, %p179_p1 }
  0x2d   :  { %65 = vadd.xlane.f32.xlu0 %v63_v8 }
  0xb6   :  { %v66_v10 = vpop.xlane.xlu0 %65 }
  0xb7   :  { %v67_v11 = vadd.f32 %v66_v10, %v64_v9 }
  0xb9   :  { %69 = vst.msk [vmem:[#allocation2] sm:$0xff] %vm54_vm0, %v67_v11 }
  0xc0   :  { %v73_v12 = vld [vmem:[#allocation2] sm:$0xff] }
  0xc1   :  { %v74_v13 = vadd.f32 0.5, %v73_v12 }
  0xc3   :  { %v75_v14 = vmax.f32 %v74_v13, 0.0 }
  0xc5   :  { %v83_v15 = vsel %vm54_vm0, %v75_v14, 0.0 }
  0xc6   :  { %84 = vadd.xlane.f32.xlu0 %v83_v15 }
 0x14f   :  { %v85_v16 = vpop.xlane.xlu0 %84 }
 0x150   :  { %v86_v17 = vrot.slane %v85_v16, 4 }
 0x152   :  { %v87_v18 = vadd.f32 %v86_v17, %v85_v16 }
 0x154   :  { %v88_v19 = vrot.slane %v87_v18, 2 }
 0x156   :  { %v89_v20 = vadd.f32 %v88_v19, %v87_v18 }
 0x158   :  { %v90_v21 = vrot.slane %v89_v20, 1 }
 0x15a   :  { %v91_v22 = vadd.f32 %v90_v21, %v89_v20 }
 0x15c   :  { %111 = vpush %v91_v22 }
 0x18d   :  { %s112_s26 = spop %111 }
 0x18e   :  { %v93_v23 = vstv %s112_s26 }
 0x18f   :  { %94 = vst [vmem:[#allocation9] sm:$0xff] %v93_v23 }
 0x190   :  { %189 = shalt.err (!%p186_p5)
}
 0x191   :  { %104 = dma.vmem_to_hbm [thread:$0]  %s102_s2, 128, %s247_s3, [#allocation5]  }
 0x192   :  { %202 = dma.done.wait [#allocation5], 128  }
 0x193   :  { %203 = vsyncadd [#allocation5], 4294967168 }
 0x194   :  { %108 = vsyncpa [#allocation4], 1 }
 0x195   :  { %109 = vsyncpa [#allocation7], 1 }
 0x196   :  { %110 = vsyncpa [#allocation5], 1 }

</bundles_post_ra>
